<compile_context>
chip_gen: v5e
topology: v5e:2x2
jax: 0.10.0
libtpu: 0.0.40
codegen_flags: <defaults>
</compile_context>

<pallas_src>
import jax
import jax.numpy as jnp
from jax.experimental import pallas as pl
from jax.experimental.pallas import tpu as pltpu


def _make_circpad_kernel(H, W, h, w, B):
    """Kernel over flat blocks: x_ref (B, H*W) -> o_ref (B, Hp*Wp)."""
    half = W // 2
    G = 8 if B % 8 == 0 else B          # sublane group size
    n_groups = B // G

    def kernel(x_ref, o_ref):

        def emit_group(start):
            # Lane-dense load of G whole (H, W) slabs: (G, H*W).
            xg = x_ref[pl.ds(start, G), :]

            def row(s):                  # input row s of each slab -> (G, W)
                return xg[:, s * W:(s + 1) * W]

            def wrap(r):                 # circular width pad -> (G, Wp)
                if w == 0:
                    return r
                return jnp.concatenate([r[:, W - w:], r, r[:, :w]], axis=1)

            def pole(s):                 # column roll by W//2, then wrap
                r = row(s)
                r = jnp.concatenate([r[:, half:], r[:, :half]], axis=1)
                return wrap(r)

            pieces = []
            # top pole band: dest rows 0..h-1 come from src rows h-1..0
            for rr in range(h):
                pieces.append(pole(h - 1 - rr))
            # middle band: interior rows with circular width wrap; when w == 0
            # the flattened middle band is exactly xg (zero extra work).
            if w == 0:
                pieces.append(xg)
            else:
                for rr in range(H):
                    pieces.append(wrap(row(rr)))
            # bottom pole band: dest rows h+H..h+2h-1 come from rows H-1..H-h
            for rr in range(h):
                pieces.append(pole(H - 1 - rr))

            out = pieces[0] if len(pieces) == 1 else jnp.concatenate(pieces, axis=1)
            # single lane-dense store of the whole padded group
            o_ref[pl.ds(start, G), :] = out

        if n_groups == 1:
            emit_group(0)
        else:
            def body(g, carry):
                emit_group(pl.multiple_of(g * G, G))
                return carry
            jax.lax.fori_loop(0, n_groups, body, None,
                              unroll=(n_groups <= 8))

    return kernel


def circ_pad(x, padding):
    """Pallas implementation of CircPad.forward for NCHW input x."""
    if isinstance(padding, int):
        h, w = padding, padding
    else:
        h, w = int(padding[0]), int(padding[1])

    N, C, H, W = x.shape
    assert H % 2 == 0 and W % 2 == 0
    # single-wrap circular pad only (same implicit assumption as the module)
    assert 0 <= h <= H and 0 <= w <= W

    if h == 0 and w == 0:
        return x

    Hp, Wp = H + 2 * h, W + 2 * w
    NC = N * C
    HW, HpWp = H * W, Hp * Wp

    # Free reshape (contiguous row-major): flattening the spatial dims is what
    # makes every DMA row / vector store lane-dense.
    xf = x.reshape(NC, HW)

    itemsize = jnp.dtype(x.dtype).itemsize

    def _pad128(n):
        return -(-n // 128) * 128

    # Per-generation VMEM budget (v5e/v6e: 128 MiB physical, v7x: 64 MiB).
    try:
        vmem_cap = int(pltpu.get_tpu_info().vmem_capacity_bytes)
    except Exception:
        vmem_cap = 64 * 1024 * 1024            # conservative (v7x physical)
    vmem_limit = min(vmem_cap * 3 // 4, 112 * 1024 * 1024)
    block_budget = min(vmem_limit // 2, 24 * 1024 * 1024)

    # Double-buffered input + output block bytes per NC row (lane-padded).
    per_row = 2 * (_pad128(HW) + _pad128(HpWp)) * itemsize
    b_cap = max(1, block_budget // per_row)
    # Keep >= 2 grid steps so both v7x TensorCores get work (harmless on the
    # single-core v5e/v6e: one extra ~0.35 us step).
    if NC > 1:
        b_cap = min(b_cap, -(-NC // 2))

    if NC >= 8 and b_cap >= 8:
        B = (min(b_cap, NC) // 8) * 8          # sublane-aligned block
        # Prefer a B that divides NC (no ragged, low-utilization tail step),
        # but don't shrink below half the budgeted size to find one.
        for cand in range(B, max(8, B // 2) - 1, -8):
            if NC % cand == 0:
                B = cand
                break
    else:
        B = NC                                 # full-extent block (small NC)

    grid = (pl.cdiv(NC, B),)
    kernel = _make_circpad_kernel(H, W, h, w, B)

    out = pl.pallas_call(
        kernel,
        out_shape=jax.ShapeDtypeStruct((NC, HpWp), x.dtype),
        grid=grid,
        in_specs=[pl.BlockSpec((B, HW), lambda i: (i, 0))],
        # Out block is full-extent on the lane axis -> unmasked, lane-dense
        # writeback DMA rows of Hp*Wp elements.  (pipeline_mode=pl.Buffered(3)
        # on this spec is a possible further sweep once VMEM headroom exists.)
        out_specs=pl.BlockSpec((B, HpWp), lambda i: (i, 0)),
        compiler_params=pltpu.CompilerParams(
            dimension_semantics=("parallel",),
            vmem_limit_bytes=int(vmem_limit),
        ),
    )(xf)

    return out.reshape(N, C, Hp, Wp)


def circ_pad_ref(x, padding):
    """Pure-JAX reference matching the PyTorch module exactly."""
    if isinstance(padding, int):
        h, w = padding, padding
    else:
        h, w = int(padding[0]), int(padding[1])
    _, _, H, W = x.shape
    if h == 0 and w == 0:
        return x
    if h == 0:
        return jnp.concatenate([x[..., -w:], x, x[..., :w]], axis=-1)
    idx = jnp.arange(-(W // 2), W // 2) % W
    up = jnp.flip(x[:, :, :h, :][..., idx], axis=2)
    down = jnp.flip(x[:, :, -h:, :][..., idx], axis=2)
    y = jnp.concatenate([up, x, down], axis=2)
    if w > 0:
        y = jnp.concatenate([y[..., -w:], y, y[..., :w]], axis=-1)
    return y


if __name__ == "__main__":
    key = jax.random.PRNGKey(0)
    x = jax.random.normal(key, (2, 4, 16, 16), dtype=jnp.float32)

    # Exercise: h>0,w>0 ; h==0,w>0 ; int padding ; h>0,w==0
    for padding in [(2, 3), (0, 2), 1, (3, 0)]:
        out = jax.block_until_ready(circ_pad(x, padding))
        ref = circ_pad_ref(x, padding)
        assert out.shape == ref.shape, (padding, out.shape, ref.shape)
        assert jnp.allclose(out, ref), f"mismatch for padding={padding}"

    print("KERNEL_OK")
</pallas_src>

<mosaic_0001>
module attributes {stable_mosaic.version = 11 : i64} {
  func.func @kernel(%arg0: i32, %arg1: memref<8x256xf32, #tpu.memory_space<vmem>>, %arg2: memref<8x440xf32, #tpu.memory_space<vmem>>) attributes {dimension_semantics = [#tpu.dimension_semantics<parallel>], iteration_bounds = array<i64: 1>, scalar_prefetch = 0 : i64, scratch_operands = 0 : i64, tpu.core_type = #tpu.core_type<tc>, window_params = [{transform_indices = @transform_0, window_bounds = array<i64: 8, 256>}, {transform_indices = @transform_1, window_bounds = array<i64: 8, 440>}]} {
    %c0 = arith.constant 0 : index
    %c0_0 = arith.constant 0 : index
    %0 = vector.load %arg1[%c0, %c0_0] : memref<8x256xf32, #tpu.memory_space<vmem>>, vector<8x256xf32>
    %1 = vector.extract_strided_slice %0 {offsets = [0, 16], sizes = [8, 16], strides = [1, 1]} : vector<8x256xf32> to vector<8x16xf32>
    %2 = vector.extract_strided_slice %1 {offsets = [0, 8], sizes = [8, 8], strides = [1, 1]} : vector<8x16xf32> to vector<8x8xf32>
    %3 = vector.extract_strided_slice %1 {offsets = [0, 0], sizes = [8, 8], strides = [1, 1]} : vector<8x16xf32> to vector<8x8xf32>
    %4 = tpu.concatenate %2, %3 in 1 : vector<8x8xf32>, vector<8x8xf32> -> vector<8x16xf32>
    %5 = vector.extract_strided_slice %4 {offsets = [0, 13], sizes = [8, 3], strides = [1, 1]} : vector<8x16xf32> to vector<8x3xf32>
    %6 = vector.extract_strided_slice %4 {offsets = [0, 0], sizes = [8, 3], strides = [1, 1]} : vector<8x16xf32> to vector<8x3xf32>
    %7 = tpu.concatenate %5, %4, %6 in 1 : vector<8x3xf32>, vector<8x16xf32>, vector<8x3xf32> -> vector<8x22xf32>
    %8 = vector.extract_strided_slice %0 {offsets = [0, 0], sizes = [8, 16], strides = [1, 1]} : vector<8x256xf32> to vector<8x16xf32>
    %9 = vector.extract_strided_slice %8 {offsets = [0, 8], sizes = [8, 8], strides = [1, 1]} : vector<8x16xf32> to vector<8x8xf32>
    %10 = vector.extract_strided_slice %8 {offsets = [0, 0], sizes = [8, 8], strides = [1, 1]} : vector<8x16xf32> to vector<8x8xf32>
    %11 = tpu.concatenate %9, %10 in 1 : vector<8x8xf32>, vector<8x8xf32> -> vector<8x16xf32>
    %12 = vector.extract_strided_slice %11 {offsets = [0, 13], sizes = [8, 3], strides = [1, 1]} : vector<8x16xf32> to vector<8x3xf32>
    %13 = vector.extract_strided_slice %11 {offsets = [0, 0], sizes = [8, 3], strides = [1, 1]} : vector<8x16xf32> to vector<8x3xf32>
    %14 = tpu.concatenate %12, %11, %13 in 1 : vector<8x3xf32>, vector<8x16xf32>, vector<8x3xf32> -> vector<8x22xf32>
    %15 = vector.extract_strided_slice %0 {offsets = [0, 0], sizes = [8, 16], strides = [1, 1]} : vector<8x256xf32> to vector<8x16xf32>
    %16 = vector.extract_strided_slice %15 {offsets = [0, 13], sizes = [8, 3], strides = [1, 1]} : vector<8x16xf32> to vector<8x3xf32>
    %17 = vector.extract_strided_slice %15 {offsets = [0, 0], sizes = [8, 3], strides = [1, 1]} : vector<8x16xf32> to vector<8x3xf32>
    %18 = tpu.concatenate %16, %15, %17 in 1 : vector<8x3xf32>, vector<8x16xf32>, vector<8x3xf32> -> vector<8x22xf32>
    %19 = vector.extract_strided_slice %0 {offsets = [0, 16], sizes = [8, 16], strides = [1, 1]} : vector<8x256xf32> to vector<8x16xf32>
    %20 = vector.extract_strided_slice %19 {offsets = [0, 13], sizes = [8, 3], strides = [1, 1]} : vector<8x16xf32> to vector<8x3xf32>
    %21 = vector.extract_strided_slice %19 {offsets = [0, 0], sizes = [8, 3], strides = [1, 1]} : vector<8x16xf32> to vector<8x3xf32>
    %22 = tpu.concatenate %20, %19, %21 in 1 : vector<8x3xf32>, vector<8x16xf32>, vector<8x3xf32> -> vector<8x22xf32>
    %23 = vector.extract_strided_slice %0 {offsets = [0, 32], sizes = [8, 16], strides = [1, 1]} : vector<8x256xf32> to vector<8x16xf32>
    %24 = vector.extract_strided_slice %23 {offsets = [0, 13], sizes = [8, 3], strides = [1, 1]} : vector<8x16xf32> to vector<8x3xf32>
    %25 = vector.extract_strided_slice %23 {offsets = [0, 0], sizes = [8, 3], strides = [1, 1]} : vector<8x16xf32> to vector<8x3xf32>
    %26 = tpu.concatenate %24, %23, %25 in 1 : vector<8x3xf32>, vector<8x16xf32>, vector<8x3xf32> -> vector<8x22xf32>
    %27 = vector.extract_strided_slice %0 {offsets = [0, 48], sizes = [8, 16], strides = [1, 1]} : vector<8x256xf32> to vector<8x16xf32>
    %28 = vector.extract_strided_slice %27 {offsets = [0, 13], sizes = [8, 3], strides = [1, 1]} : vector<8x16xf32> to vector<8x3xf32>
    %29 = vector.extract_strided_slice %27 {offsets = [0, 0], sizes = [8, 3], strides = [1, 1]} : vector<8x16xf32> to vector<8x3xf32>
    %30 = tpu.concatenate %28, %27, %29 in 1 : vector<8x3xf32>, vector<8x16xf32>, vector<8x3xf32> -> vector<8x22xf32>
    %31 = vector.extract_strided_slice %0 {offsets = [0, 64], sizes = [8, 16], strides = [1, 1]} : vector<8x256xf32> to vector<8x16xf32>
    %32 = vector.extract_strided_slice %31 {offsets = [0, 13], sizes = [8, 3], strides = [1, 1]} : vector<8x16xf32> to vector<8x3xf32>
    %33 = vector.extract_strided_slice %31 {offsets = [0, 0], sizes = [8, 3], strides = [1, 1]} : vector<8x16xf32> to vector<8x3xf32>
    %34 = tpu.concatenate %32, %31, %33 in 1 : vector<8x3xf32>, vector<8x16xf32>, vector<8x3xf32> -> vector<8x22xf32>
    %35 = vector.extract_strided_slice %0 {offsets = [0, 80], sizes = [8, 16], strides = [1, 1]} : vector<8x256xf32> to vector<8x16xf32>
    %36 = vector.extract_strided_slice %35 {offsets = [0, 13], sizes = [8, 3], strides = [1, 1]} : vector<8x16xf32> to vector<8x3xf32>
    %37 = vector.extract_strided_slice %35 {offsets = [0, 0], sizes = [8, 3], strides = [1, 1]} : vector<8x16xf32> to vector<8x3xf32>
    %38 = tpu.concatenate %36, %35, %37 in 1 : vector<8x3xf32>, vector<8x16xf32>, vector<8x3xf32> -> vector<8x22xf32>
    %39 = vector.extract_strided_slice %0 {offsets = [0, 96], sizes = [8, 16], strides = [1, 1]} : vector<8x256xf32> to vector<8x16xf32>
    %40 = vector.extract_strided_slice %39 {offsets = [0, 13], sizes = [8, 3], strides = [1, 1]} : vector<8x16xf32> to vector<8x3xf32>
    %41 = vector.extract_strided_slice %39 {offsets = [0, 0], sizes = [8, 3], strides = [1, 1]} : vector<8x16xf32> to vector<8x3xf32>
    %42 = tpu.concatenate %40, %39, %41 in 1 : vector<8x3xf32>, vector<8x16xf32>, vector<8x3xf32> -> vector<8x22xf32>
    %43 = vector.extract_strided_slice %0 {offsets = [0, 112], sizes = [8, 16], strides = [1, 1]} : vector<8x256xf32> to vector<8x16xf32>
    %44 = vector.extract_strided_slice %43 {offsets = [0, 13], sizes = [8, 3], strides = [1, 1]} : vector<8x16xf32> to vector<8x3xf32>
    %45 = vector.extract_strided_slice %43 {offsets = [0, 0], sizes = [8, 3], strides = [1, 1]} : vector<8x16xf32> to vector<8x3xf32>
    %46 = tpu.concatenate %44, %43, %45 in 1 : vector<8x3xf32>, vector<8x16xf32>, vector<8x3xf32> -> vector<8x22xf32>
    %47 = vector.extract_strided_slice %0 {offsets = [0, 128], sizes = [8, 16], strides = [1, 1]} : vector<8x256xf32> to vector<8x16xf32>
    %48 = vector.extract_strided_slice %47 {offsets = [0, 13], sizes = [8, 3], strides = [1, 1]} : vector<8x16xf32> to vector<8x3xf32>
    %49 = vector.extract_strided_slice %47 {offsets = [0, 0], sizes = [8, 3], strides = [1, 1]} : vector<8x16xf32> to vector<8x3xf32>
    %50 = tpu.concatenate %48, %47, %49 in 1 : vector<8x3xf32>, vector<8x16xf32>, vector<8x3xf32> -> vector<8x22xf32>
    %51 = vector.extract_strided_slice %0 {offsets = [0, 144], sizes = [8, 16], strides = [1, 1]} : vector<8x256xf32> to vector<8x16xf32>
    %52 = vector.extract_strided_slice %51 {offsets = [0, 13], sizes = [8, 3], strides = [1, 1]} : vector<8x16xf32> to vector<8x3xf32>
    %53 = vector.extract_strided_slice %51 {offsets = [0, 0], sizes = [8, 3], strides = [1, 1]} : vector<8x16xf32> to vector<8x3xf32>
    %54 = tpu.concatenate %52, %51, %53 in 1 : vector<8x3xf32>, vector<8x16xf32>, vector<8x3xf32> -> vector<8x22xf32>
    %55 = vector.extract_strided_slice %0 {offsets = [0, 160], sizes = [8, 16], strides = [1, 1]} : vector<8x256xf32> to vector<8x16xf32>
    %56 = vector.extract_strided_slice %55 {offsets = [0, 13], sizes = [8, 3], strides = [1, 1]} : vector<8x16xf32> to vector<8x3xf32>
    %57 = vector.extract_strided_slice %55 {offsets = [0, 0], sizes = [8, 3], strides = [1, 1]} : vector<8x16xf32> to vector<8x3xf32>
    %58 = tpu.concatenate %56, %55, %57 in 1 : vector<8x3xf32>, vector<8x16xf32>, vector<8x3xf32> -> vector<8x22xf32>
    %59 = vector.extract_strided_slice %0 {offsets = [0, 176], sizes = [8, 16], strides = [1, 1]} : vector<8x256xf32> to vector<8x16xf32>
    %60 = vector.extract_strided_slice %59 {offsets = [0, 13], sizes = [8, 3], strides = [1, 1]} : vector<8x16xf32> to vector<8x3xf32>
    %61 = vector.extract_strided_slice %59 {offsets = [0, 0], sizes = [8, 3], strides = [1, 1]} : vector<8x16xf32> to vector<8x3xf32>
    %62 = tpu.concatenate %60, %59, %61 in 1 : vector<8x3xf32>, vector<8x16xf32>, vector<8x3xf32> -> vector<8x22xf32>
    %63 = vector.extract_strided_slice %0 {offsets = [0, 192], sizes = [8, 16], strides = [1, 1]} : vector<8x256xf32> to vector<8x16xf32>
    %64 = vector.extract_strided_slice %63 {offsets = [0, 13], sizes = [8, 3], strides = [1, 1]} : vector<8x16xf32> to vector<8x3xf32>
    %65 = vector.extract_strided_slice %63 {offsets = [0, 0], sizes = [8, 3], strides = [1, 1]} : vector<8x16xf32> to vector<8x3xf32>
    %66 = tpu.concatenate %64, %63, %65 in 1 : vector<8x3xf32>, vector<8x16xf32>, vector<8x3xf32> -> vector<8x22xf32>
    %67 = vector.extract_strided_slice %0 {offsets = [0, 208], sizes = [8, 16], strides = [1, 1]} : vector<8x256xf32> to vector<8x16xf32>
    %68 = vector.extract_strided_slice %67 {offsets = [0, 13], sizes = [8, 3], strides = [1, 1]} : vector<8x16xf32> to vector<8x3xf32>
    %69 = vector.extract_strided_slice %67 {offsets = [0, 0], sizes = [8, 3], strides = [1, 1]} : vector<8x16xf32> to vector<8x3xf32>
    %70 = tpu.concatenate %68, %67, %69 in 1 : vector<8x3xf32>, vector<8x16xf32>, vector<8x3xf32> -> vector<8x22xf32>
    %71 = vector.extract_strided_slice %0 {offsets = [0, 224], sizes = [8, 16], strides = [1, 1]} : vector<8x256xf32> to vector<8x16xf32>
    %72 = vector.extract_strided_slice %71 {offsets = [0, 13], sizes = [8, 3], strides = [1, 1]} : vector<8x16xf32> to vector<8x3xf32>
    %73 = vector.extract_strided_slice %71 {offsets = [0, 0], sizes = [8, 3], strides = [1, 1]} : vector<8x16xf32> to vector<8x3xf32>
    %74 = tpu.concatenate %72, %71, %73 in 1 : vector<8x3xf32>, vector<8x16xf32>, vector<8x3xf32> -> vector<8x22xf32>
    %75 = vector.extract_strided_slice %0 {offsets = [0, 240], sizes = [8, 16], strides = [1, 1]} : vector<8x256xf32> to vector<8x16xf32>
    %76 = vector.extract_strided_slice %75 {offsets = [0, 13], sizes = [8, 3], strides = [1, 1]} : vector<8x16xf32> to vector<8x3xf32>
    %77 = vector.extract_strided_slice %75 {offsets = [0, 0], sizes = [8, 3], strides = [1, 1]} : vector<8x16xf32> to vector<8x3xf32>
    %78 = tpu.concatenate %76, %75, %77 in 1 : vector<8x3xf32>, vector<8x16xf32>, vector<8x3xf32> -> vector<8x22xf32>
    %79 = vector.extract_strided_slice %0 {offsets = [0, 240], sizes = [8, 16], strides = [1, 1]} : vector<8x256xf32> to vector<8x16xf32>
    %80 = vector.extract_strided_slice %79 {offsets = [0, 8], sizes = [8, 8], strides = [1, 1]} : vector<8x16xf32> to vector<8x8xf32>
    %81 = vector.extract_strided_slice %79 {offsets = [0, 0], sizes = [8, 8], strides = [1, 1]} : vector<8x16xf32> to vector<8x8xf32>
    %82 = tpu.concatenate %80, %81 in 1 : vector<8x8xf32>, vector<8x8xf32> -> vector<8x16xf32>
    %83 = vector.extract_strided_slice %82 {offsets = [0, 13], sizes = [8, 3], strides = [1, 1]} : vector<8x16xf32> to vector<8x3xf32>
    %84 = vector.extract_strided_slice %82 {offsets = [0, 0], sizes = [8, 3], strides = [1, 1]} : vector<8x16xf32> to vector<8x3xf32>
    %85 = tpu.concatenate %83, %82, %84 in 1 : vector<8x3xf32>, vector<8x16xf32>, vector<8x3xf32> -> vector<8x22xf32>
    %86 = vector.extract_strided_slice %0 {offsets = [0, 224], sizes = [8, 16], strides = [1, 1]} : vector<8x256xf32> to vector<8x16xf32>
    %87 = vector.extract_strided_slice %86 {offsets = [0, 8], sizes = [8, 8], strides = [1, 1]} : vector<8x16xf32> to vector<8x8xf32>
    %88 = vector.extract_strided_slice %86 {offsets = [0, 0], sizes = [8, 8], strides = [1, 1]} : vector<8x16xf32> to vector<8x8xf32>
    %89 = tpu.concatenate %87, %88 in 1 : vector<8x8xf32>, vector<8x8xf32> -> vector<8x16xf32>
    %90 = vector.extract_strided_slice %89 {offsets = [0, 13], sizes = [8, 3], strides = [1, 1]} : vector<8x16xf32> to vector<8x3xf32>
    %91 = vector.extract_strided_slice %89 {offsets = [0, 0], sizes = [8, 3], strides = [1, 1]} : vector<8x16xf32> to vector<8x3xf32>
    %92 = tpu.concatenate %90, %89, %91 in 1 : vector<8x3xf32>, vector<8x16xf32>, vector<8x3xf32> -> vector<8x22xf32>
    %93 = tpu.concatenate %7, %14, %18, %22, %26, %30, %34, %38, %42, %46, %50, %54, %58, %62, %66, %70 in 1 : vector<8x22xf32>, vector<8x22xf32>, vector<8x22xf32>, vector<8x22xf32>, vector<8x22xf32>, vector<8x22xf32>, vector<8x22xf32>, vector<8x22xf32>, vector<8x22xf32>, vector<8x22xf32>, vector<8x22xf32>, vector<8x22xf32>, vector<8x22xf32>, vector<8x22xf32>, vector<8x22xf32>, vector<8x22xf32> -> vector<8x352xf32>
    %94 = tpu.concatenate %74, %78, %85, %92 in 1 : vector<8x22xf32>, vector<8x22xf32>, vector<8x22xf32>, vector<8x22xf32> -> vector<8x88xf32>
    %95 = tpu.concatenate %93, %94 in 1 : vector<8x352xf32>, vector<8x88xf32> -> vector<8x440xf32>
    %c0_1 = arith.constant 0 : index
    %c0_2 = arith.constant 0 : index
    %96 = vector.load %arg2[%c0_1, %c0_2] : memref<8x440xf32, #tpu.memory_space<vmem>>, vector<8x440xf32>
    tpu.vector_store %arg2[%c0_1, %c0_2], %95 {strides = array<i32>} : memref<8x440xf32, #tpu.memory_space<vmem>>, vector<8x440xf32>,
    return
  }
  func.func @transform_0(%arg0: i32) -> (i32, i32) {
    %c0_i32 = arith.constant 0 : i32
    %c0_i32_0 = arith.constant 0 : i32
    return %arg0, %c0_i32 : i32, i32
  }
  func.func @transform_1(%arg0: i32) -> (i32, i32) {
    %c0_i32 = arith.constant 0 : i32
    %c0_i32_0 = arith.constant 0 : i32
    return %arg0, %c0_i32 : i32, i32
  }
}

</mosaic_0001>

<bundles_post_ra>
// kernel: tpu_custom_call.1
= control target key start
LH: loop header
LB: loop body
LE: loop exit
PB: predicated region body
PF: predicated region fallthrough
CT: control target
= control target key end

     0   :  { %6 = vsyncpa [#allocation3], 0  ;;  %s546_s0 = inlined_call_operand.hbm [shape: f32[8,256], index: 0, kind: input, shape index: {}]   ;;  %s547_s1 = inlined_call_operand.hbm [shape: f32[8,440], index: 1, kind: output, shape index: {}]  }
   0x1   :  { %7 = vsyncpa [#allocation4], 0  ;;  %s13_s8 = sshll.u32 %s546_s0, 4  ;;  %s394_s9 = smov [#allocation2]   ;;  %s14_s8 = int_to_ptr.hbm [resolvable:$true] %s13_s8 }
   0x2   :  { %s15_s10 = sshll.u32 %s394_s9, 4  ;;  %s16_s10 = int_to_ptr.vmem [resolvable:$true] %s15_s10 }
   0x3   :  { %18 = dma.hbm_to_vmem [thread:$0]  %s14_s8, 256, %s16_s10, [#allocation3]  }
   0x4   :  { %390 = dma.done.wait [#allocation3], 256  }
   0x5   :  { %391 = vsyncadd [#allocation3], 4294967040  ;;  %v24_v0 = vld [vmem:[#allocation2 + $0x8] sm:$0xff]  ;;  %s395_s11 = smov 40   ;;  %s396_s12 = smov 8   ;;  %v23_v1 = vld [vmem:[#allocation2] sm:$0xff] }
   0x6   :  { %164 = vrot.lane.b32.xlu1 %v24_v0, %s395_s11  ;;  %145 = vrot.lane.b32.xlu0 %v24_v0, %s396_s12  ;;  %s397_s13 = smov 120   ;;  %s398_s14 = smov 24   ;;  %vm32_vm0 = vcmask 64512   ;;  %vm44_vm1 = vcmask 23552   ;;  %vm46_vm2 = vcmask 154624   ;;  %vm240_vm3 = vcmask 179200  }
   0x7   :  { %29 = vrot.lane.b32.xlu2 %v23_v1, %s397_s13  ;;  %s399_s15 = smov 104   ;;  %s400_s0 = smov 3   ;;  %vm242_vm4 = vcmask 359424   ;;  %vm244_vm5 = vcmask 539648   ;;  %vm250_vm6 = vcmask 31744   ;;  %vm252_vm7 = vcmask 211968  }
   0x8   :  { %s401_s16 = smov 19   ;;  %s402_s17 = smov 35   ;;  %vm254_vm8 = vcmask 392192   ;;  %vm256_vm9 = vcmask 572416   ;;  %vm258_vm10 = vcmask 752640   ;;  %vm260_vm11 = vcmask 932864  }
   0x9   :  { %s403_s18 = smov 115   ;;  %s404_s19 = smov 83   ;;  %vm246_vm12 = vcmask 719872   ;;  %vm248_vm13 = vcmask 900096   ;;  %vm263_vm14 = vcmask 244736   ;;  %vm265_vm15 = vcmask 424960  }
   0xa   :  { %s405_s20 = smov 67   ;;  %s406_s21 = smov 99  }
   0xb   :  { %s407_s22 = smov 51   ;;  %s408_s23 = smov 22  }
   0xc   :  { %s409_s24 = smov 44   ;;  %s410_s25 = smov 66  }
   0xd   :  { %s411_s26 = smov 110   ;;  %s412_s27 = smov 4  }
   0xe   :  { %148 = vrot.lane.b32.xlu0 %v24_v0, %s398_s14  ;;  %26 = vrot.lane.b32.xlu1 %v23_v1, %s399_s15  ;;  %s413_s28 = smov 114   ;;  %s414_s29 = smov 26  }
   0xf   :  { %48 = vrot.lane.b32.xlu2 %v23_v1, %s396_s12  ;;  %s415_s30 = smov 48   ;;  %s416_s2 = smov 70  }
  0x10   :  { %s417_s3 = smov 30   ;;  %s418_s4 = smov 92  }
  0x11   :  { %s419_s5 = smov 88   ;;  %s420_s6 = smov 52  }
  0x12   :  { %s421_s7 = smov 74   ;;  %s422_s8 = smov 96  }
  0x13   :  { %s423_s9 = smov [#allocation5]   ;;  %s302_s13 = sshll.u32 %s547_s1, 4  ;;  %s303_s13 = int_to_ptr.hbm [resolvable:$true] %s302_s13 }
  0x14   :  { %s300_s10 = sshll.u32 %s423_s9, 4  ;;  %s301_s10 = int_to_ptr.vmem [resolvable:$true] %s300_s10 }
  0x16   :  { %108 = vrot.lane.b32.xlu0 %v24_v0, %s400_s0  ;;  %111 = vrot.lane.b32.xlu1 %v24_v0, %s401_s16 }
  0x17   :  { %136 = vrot.lane.b32.xlu2 %v24_v0, %s402_s17 }
  0x1e   :  { %64 = vrot.lane.b32.xlu0 %v23_v1, %s403_s18 }
  0x61   :  { %v30_v3 = vpop.permute.xlu2 %29 }
  0x69   :  { %v49_v7 = vpop.permute.xlu2 %48 }
  0x6a   :  { %v51_v8 = vsel %vm32_vm0, %v30_v3, %v49_v7 }
  0x71   :  { %v470_v15 = vpop.permute.xlu2 %136 }
  0x78   :  { %v165_v2 = vpop.permute.xlu1 %164  ;;  %v146_v6 = vpop.permute.xlu0 %145 }
  0x80   :  { %v27_v4 = vpop.permute.xlu1 %26  ;;  %v149_v9 = vpop.permute.xlu0 %148 }
  0x81   :  { %v33_v5 = vsel %vm32_vm0, %v27_v4, %v30_v3  ;;  %v151_v10 = vsel %vm32_vm0, %v146_v6, %v149_v9  ;;  %v167_v11 = vsel %vm32_vm0, %v149_v9, %v165_v2 }
  0x82   :  { %41 = vrot.lane.b32.xlu1 %v33_v5, %s401_s16  ;;  %38 = vrot.lane.b32.xlu0 %v33_v5, %s400_s0 }
  0x83   :  { %35 = vrot.lane.b32.xlu2 %v33_v5, %s403_s18 }
  0x88   :  { %v463_v12 = vpop.permute.xlu0 %108  ;;  %v465_v13 = vpop.permute.xlu1 %111 }
  0x89   :  { %v143_v14 = vsel %vm44_vm1, %v463_v12, %v465_v13 }
  0x8a   :  { %56 = vrot.lane.b32.xlu1 %v51_v8, %s400_s0  ;;  %53 = vrot.lane.b32.xlu0 %v51_v8, %s403_s18  ;;  %v144_v16 = vsel %vm46_vm2, %v143_v14, %v470_v15 }
  0x8b   :  { %59 = vrot.lane.b32.xlu2 %v51_v8, %s401_s16 }
  0x90   :  { %v475_v18 = vpop.permute.xlu0 %64 }
  0x92   :  { %156 = vrot.lane.b32.xlu1 %v151_v10, %s400_s0  ;;  %153 = vrot.lane.b32.xlu0 %v151_v10, %s403_s18 }
  0x93   :  { %159 = vrot.lane.b32.xlu2 %v151_v10, %s401_s16 }
  0x9a   :  { %172 = vrot.lane.b32.xlu1 %v167_v11, %s400_s0  ;;  %169 = vrot.lane.b32.xlu0 %v167_v11, %s403_s18 }
  0x9b   :  { %175 = vrot.lane.b32.xlu2 %v167_v11, %s401_s16 }
  0xa2   :  { %67 = vrot.lane.b32.xlu1 %v23_v1, %s400_s0  ;;  %80 = vrot.lane.b32.xlu0 %v23_v1, %s404_s19 }
  0xa3   :  { %70 = vrot.lane.b32.xlu2 %v23_v1, %s401_s16 }
  0xaa   :  { %85 = vrot.lane.b32.xlu1 %v23_v1, %s405_s20  ;;  %75 = vrot.lane.b32.xlu0 %v23_v1, %s406_s21 }
  0xab   :  { %90 = vrot.lane.b32.xlu2 %v23_v1, %s407_s22 }
  0xb2   :  { %95 = vrot.lane.b32.xlu1 %v23_v1, %s402_s17  ;;  %116 = vrot.lane.b32.xlu0 %v24_v0, %s406_s21 }
  0xb3   :  { %105 = vrot.lane.b32.xlu2 %v24_v0, %s403_s18 }
  0xba   :  { %121 = vrot.lane.b32.xlu1 %v24_v0, %s404_s19  ;;  %131 = vrot.lane.b32.xlu0 %v24_v0, %s407_s22 }
  0xbb   :  { %126 = vrot.lane.b32.xlu2 %v24_v0, %s405_s20 }
  0xc2   :  { %270 = vrot.lane.b32.xlu1 %v144_v16, %s408_s23 }
  0xdd   :  { %v36_v17 = vpop.permute.xlu2 %35 }
  0xe5   :  { %v60_v19 = vpop.permute.xlu2 %59 }
  0xed   :  { %v160_v24 = vpop.permute.xlu2 %159 }
  0xf4   :  { %v39_v20 = vpop.permute.xlu0 %38  ;;  %v42_v21 = vpop.permute.xlu1 %41 }
  0xf5   :  { %v45_v22 = vsel %vm44_vm1, %v36_v17, %v39_v20  ;;  %v176_v31 = vpop.permute.xlu2 %175 }
  0xf6   :  { %v479_v23 = vsel %vm46_vm2, %v45_v22, %v42_v21 }
  0xfc   :  { %v54_v25 = vpop.permute.xlu0 %53  ;;  %v57_v26 = vpop.permute.xlu1 %56 }
  0xfd   :  { %v62_v27 = vsel %vm44_vm1, %v54_v25, %v57_v26  ;;  %v71_v38 = vpop.permute.xlu2 %70 }
  0xfe   :  { %v483_v28 = vsel %vm46_vm2, %v62_v27, %v60_v19  ;;  %v141_v19 = vsel %vm44_vm1, %v465_v13, %v470_v15 }
 0x104   :  { %v154_v29 = vpop.permute.xlu0 %153  ;;  %v157_v30 = vpop.permute.xlu1 %156 }
 0x105   :  { %v162_v32 = vsel %vm44_vm1, %v154_v29, %v157_v30  ;;  %v91_v41 = vpop.permute.xlu2 %90 }
 0x106   :  { %v163_v33 = vsel %vm46_vm2, %v162_v32, %v160_v24 }
 0x107   :  { %274 = vrot.lane.b32.xlu2 %v163_v33, %s409_s24 }
 0x10c   :  { %v170_v34 = vpop.permute.xlu0 %169  ;;  %v173_v35 = vpop.permute.xlu1 %172 }
 0x10d   :  { %v178_v36 = vsel %vm44_vm1, %v170_v34, %v173_v35  ;;  %v106_v48 = vpop.permute.xlu2 %105 }
 0x10e   :  { %v179_v37 = vsel %vm46_vm2, %v178_v36, %v176_v31  ;;  %v114_v7 = vsel %vm44_vm1, %v106_v48, %v463_v12 }
 0x10f   :  { %278 = vrot.lane.b32.xlu0 %v179_v37, %s410_s25  ;;  %v115_v10 = vsel %vm46_vm2, %v114_v7, %v465_v13 }
 0x114   :  { %v81_v39 = vpop.permute.xlu0 %80  ;;  %v68_v40 = vpop.permute.xlu1 %67 }
 0x115   :  { %v73_v56 = vsel %vm44_vm1, %v475_v18, %v68_v40  ;;  %v102_v62 = vsel %vm44_vm1, %v68_v40, %v71_v38  ;;  %v127_v63 = vpop.permute.xlu2 %126 }
 0x116   :  { %v74_v60 = vsel %vm46_vm2, %v73_v56, %v71_v38 }
 0x11c   :  { %v76_v42 = vpop.permute.xlu0 %75  ;;  %v86_v43 = vpop.permute.xlu1 %85 }
 0x11d   :  { %v88_v44 = vsel %vm44_vm1, %v86_v43, %v81_v39  ;;  %v93_v45 = vsel %vm44_vm1, %v91_v41, %v86_v43  ;;  %v78_v1 = vsel %vm44_vm1, %v76_v42, %v475_v18  ;;  %v83_v8 = vsel %vm44_vm1, %v81_v39, %v76_v42 }
 0x11e   :  { %v89_v46 = vsel %vm46_vm2, %v88_v44, %v76_v42  ;;  %v94_v47 = vsel %vm46_vm2, %v93_v45, %v81_v39  ;;  %v79_v4 = vsel %vm46_vm2, %v78_v1, %v68_v40  ;;  %v84_v11 = vsel %vm46_vm2, %v83_v8, %v475_v18 }
 0x11f   :  { %197 = vrot.lane.b32.xlu2 %v89_v46, %s411_s26  ;;  %201 = vrot.lane.b32.xlu0 %v94_v47, %s412_s27 }
 0x124   :  { %v117_v49 = vpop.permute.xlu0 %116  ;;  %v96_v50 = vpop.permute.xlu1 %95 }
 0x125   :  { %v119_v51 = vsel %vm44_vm1, %v117_v49, %v106_v48  ;;  %v98_v52 = vsel %vm44_vm1, %v96_v50, %v91_v41  ;;  %v100_v55 = vsel %vm44_vm1, %v71_v38, %v96_v50  ;;  %v103_v2 = vsel %vm46_vm2, %v102_v62, %v96_v50 }
 0x126   :  { %v120_v53 = vsel %vm46_vm2, %v119_v51, %v463_v12  ;;  %v99_v54 = vsel %vm46_vm2, %v98_v52, %v86_v43  ;;  %v101_v58 = vsel %vm46_vm2, %v100_v55, %v91_v41 }
 0x127   :  { %221 = vrot.lane.b32.xlu2 %v120_v53, %s413_s28  ;;  %205 = vrot.lane.b32.xlu1 %v99_v54, %s414_s29 }
 0x12c   :  { %v122_v57 = vpop.permute.xlu1 %121  ;;  %v132_v5 = vpop.permute.xlu0 %131 }
 0x12d   :  { %v124_v59 = vsel %vm44_vm1, %v122_v57, %v117_v49  ;;  %v129_v0 = vsel %vm44_vm1, %v127_v63, %v122_v57  ;;  %v134_v6 = vsel %vm44_vm1, %v132_v5, %v127_v63  ;;  %v139_v14 = vsel %vm44_vm1, %v470_v15, %v132_v5 }
 0x12e   :  { %v125_v61 = vsel %vm46_vm2, %v124_v59, %v106_v48  ;;  %v130_v3 = vsel %vm46_vm2, %v129_v0, %v117_v49  ;;  %v135_v9 = vsel %vm46_vm2, %v134_v6, %v122_v57  ;;  %v140_v12 = vsel %vm46_vm2, %v139_v14, %v127_v63 }
 0x12f   :  { %209 = vrot.lane.b32.xlu2 %v101_v58, %s415_s30  ;;  %185 = vrot.lane.b32.xlu1 %v74_v60, %s409_s24  ;;  %v142_v20 = vsel %vm46_vm2, %v141_v19, %v132_v5  ;;  %vm267_vm1 = vcmask 605184   ;;  %vm288_vm2 = vcmask 785408  }
 0x130   :  { %225 = vrot.lane.b32.xlu0 %v125_v61, %s396_s12 }
 0x134   :  { %v271_v18 = vpop.permute.xlu1 %270 }
 0x135   :  { %v281_v21 = vsel %vm240_vm3, %v142_v20, %v271_v18 }
 0x137   :  { %213 = vrot.lane.b32.xlu2 %v103_v2, %s416_s2  ;;  %189 = vrot.lane.b32.xlu1 %v79_v4, %s410_s25 }
 0x138   :  { %229 = vrot.lane.b32.xlu0 %v130_v3, %s417_s3 }
 0x13f   :  { %217 = vrot.lane.b32.xlu2 %v115_v10, %s418_s4  ;;  %193 = vrot.lane.b32.xlu1 %v84_v11, %s419_s5 }
 0x140   :  { %233 = vrot.lane.b32.xlu0 %v135_v9, %s420_s6 }
 0x147   :  { %181 = vrot.lane.b32.xlu1 %v483_v28, %s408_s23 }
 0x148   :  { %237 = vrot.lane.b32.xlu0 %v140_v12, %s421_s7 }
 0x161   :  { %v275_v16 = vpop.permute.xlu2 %274 }
 0x162   :  { %v282_v22 = vsel %vm242_vm4, %v281_v21, %v275_v16 }
 0x179   :  { %v198_v17 = vpop.permute.xlu2 %197 }
 0x181   :  { %v279_v24 = vpop.permute.xlu0 %278  ;;  %v222_v25 = vpop.permute.xlu2 %221 }
 0x182   :  { %v283_v26 = vsel %vm244_vm5, %v282_v22, %v279_v24 }
 0x183   :  { %285 = vrot.lane.b32.xlu1 %v283_v26, %s422_s8 }
 0x189   :  { %v210_v27 = vpop.permute.xlu2 %209 }
 0x191   :  { %v214_v28 = vpop.permute.xlu2 %213  ;;  %v202_v29 = vpop.permute.xlu0 %201 }
 0x192   :  { %v251_v30 = vsel %vm250_vm6, %v198_v17, %v202_v29 }
 0x199   :  { %v206_v13 = vpop.permute.xlu1 %205  ;;  %v218_v32 = vpop.permute.xlu2 %217 }
 0x19a   :  { %v253_v15 = vsel %vm252_vm7, %v251_v30, %v206_v13 }
 0x19b   :  { %v255_v31 = vsel %vm254_vm8, %v253_v15, %v210_v27 }
 0x19c   :  { %v257_v33 = vsel %vm256_vm9, %v255_v31, %v214_v28 }
 0x19d   :  { %v259_v34 = vsel %vm258_vm10, %v257_v33, %v218_v32 }
 0x19e   :  { %v261_v35 = vsel %vm260_vm11, %v259_v34, %v222_v25 }
 0x19f   :  { %291 = vst [vmem:[#allocation5 + $0x8] sm:$0xff] %v261_v35 }
 0x1a1   :  { %v186_v36 = vpop.permute.xlu1 %185 }
 0x1a2   :  { %v226_v45 = vpop.permute.xlu0 %225 }
 0x1a3   :  { %v262_v48 = vsel %vm32_vm0, %v222_v25, %v226_v45 }
 0x1a9   :  { %v190_v37 = vpop.permute.xlu1 %189 }
 0x1aa   :  { %v230_v46 = vpop.permute.xlu0 %229 }
 0x1b1   :  { %v194_v38 = vpop.permute.xlu1 %193 }
 0x1b2   :  { %v234_v47 = vpop.permute.xlu0 %233 }
 0x1b9   :  { %v182_v39 = vpop.permute.xlu1 %181 }
 0x1ba   :  { %v241_v40 = vsel %vm240_vm3, %v479_v23, %v182_v39  ;;  %v238_v49 = vpop.permute.xlu0 %237  ;;  %v264_v23 = vsel %vm263_vm14, %v262_v48, %v230_v46  ;;  %vm293_vm3 = vcmask 457728  }
 0x1bb   :  { %v243_v41 = vsel %vm242_vm4, %v241_v40, %v186_v36  ;;  %v266_v50 = vsel %vm265_vm15, %v264_v23, %v234_v47 }
 0x1bc   :  { %v245_v42 = vsel %vm244_vm5, %v243_v41, %v190_v37  ;;  %v268_v51 = vsel %vm267_vm1, %v266_v50, %v238_v49 }
 0x1bd   :  { %v247_v43 = vsel %vm246_vm12, %v245_v42, %v194_v38 }
 0x1be   :  { %v249_v44 = vsel %vm248_vm13, %v247_v43, %v198_v17 }
 0x1bf   :  { %290 = vst [vmem:[#allocation5] sm:$0xff] %v249_v44 }
 0x1f5   :  { %v286_v52 = vpop.permute.xlu1 %285 }
 0x1f6   :  { %v289_v53 = vsel %vm288_vm2, %v268_v51, %v286_v52  ;;  %294 = vst.msk [vmem:[#allocation5 + $0x18] sm:$0xff] %vm293_vm3, %v286_v52 }
 0x1f7   :  { %292 = vst [vmem:[#allocation5 + $0x10] sm:$0xff] %v289_v53 }
 0x1f8   :  { %305 = dma.vmem_to_hbm [thread:$0]  %s301_s10, 512, %s303_s13, [#allocation4]  }
 0x1f9   :  { %392 = dma.done.wait [#allocation4], 512  }
 0x1fa   :  { %393 = vsyncadd [#allocation4], 4294966784 }
 0x1fb   :  { %310 = vsyncpa [#allocation3], 1 }
 0x1fc   :  { %311 = vsyncpa [#allocation4], 1 }

</bundles_post_ra>
